<compile_context>
chip_gen: v5e
topology: v5e:2x2
jax: 0.10.0
libtpu: 0.0.40
codegen_flags: <defaults>
</compile_context>

<pallas_src>
import functools

import jax
import jax.numpy as jnp
from jax.experimental import pallas as pl
from jax.experimental.pallas import tpu as pltpu

NEG_INF = -1e30  # bias for padded class columns -> exp() underflows to 0


def _round_up(n, m):
    return ((n + m - 1) // m) * m


# ---------------------------------------------------------------------------
# Kernel A: support = x @ W  (per-row-tile, weights fully resident in VMEM)
# ---------------------------------------------------------------------------
def _support_kernel(x_ref, w_ref, out_ref):
    out_ref[...] = jnp.dot(
        x_ref[...], w_ref[...], preferred_element_type=jnp.float32
    ).astype(out_ref.dtype)


def _compute_support(x, w, *, tm):
    n_p, f_in = x.shape
    f_out = w.shape[1]
    return pl.pallas_call(
        _support_kernel,
        out_shape=jax.ShapeDtypeStruct((n_p, f_out), jnp.bfloat16),
        grid_spec=pltpu.PrefetchScalarGridSpec(
            num_scalar_prefetch=0,
            grid=(n_p // tm,),
            in_specs=[
                pl.BlockSpec((tm, f_in), lambda i: (i, 0)),
                pl.BlockSpec((f_in, f_out), lambda i: (0, 0)),
            ],
            out_specs=pl.BlockSpec((tm, f_out), lambda i: (i, 0)),
        ),
        compiler_params=pltpu.CompilerParams(
            dimension_semantics=("parallel",)
        ),
    )(x, w)


# ---------------------------------------------------------------------------
# Kernel B: z = adj @ support + b  with fused epilogue (ReLU or log_softmax)
# ---------------------------------------------------------------------------
def _agg_kernel(adj_ref, s_ref, b_ref, out_ref, acc_ref, *, epilogue):
    k = pl.program_id(1)

    @pl.when(k == 0)
    def _():
        acc_ref[...] = jnp.zeros_like(acc_ref)

    acc_ref[...] += jnp.dot(
        adj_ref[...], s_ref[...], preferred_element_type=jnp.float32
    )

    @pl.when(k == pl.num_programs(1) - 1)
    def _():
        # Bias add (and broadcast) only in the finalize branch.
        z = acc_ref[...] + b_ref[...]
        if epilogue == "relu":
            out_ref[...] = jnp.maximum(z, 0.0).astype(out_ref.dtype)
        else:  # log_softmax over the class (lane) axis
            m = jnp.max(z, axis=1, keepdims=True)
            sh = z - m
            lse = jnp.log(jnp.sum(jnp.exp(sh), axis=1, keepdims=True))
            out_ref[...] = (sh - lse).astype(out_ref.dtype)


def _aggregate(adj, support, bias, *, tm, tk, epilogue, out_dtype):
    n_p = adj.shape[0]
    f_out = support.shape[1]
    kernel = functools.partial(_agg_kernel, epilogue=epilogue)
    return pl.pallas_call(
        kernel,
        out_shape=jax.ShapeDtypeStruct((n_p, f_out), out_dtype),
        grid_spec=pltpu.PrefetchScalarGridSpec(
            num_scalar_prefetch=0,
            grid=(n_p // tm, n_p // tk),
            in_specs=[
                pl.BlockSpec((tm, tk), lambda i, k: (i, k)),
                pl.BlockSpec((tk, f_out), lambda i, k: (k, 0)),
                pl.BlockSpec((1, f_out), lambda i, k: (0, 0)),
            ],
            out_specs=pl.BlockSpec((tm, f_out), lambda i, k: (i, 0)),
            scratch_shapes=[pltpu.VMEM((tm, f_out), jnp.float32)],
        ),
        compiler_params=pltpu.CompilerParams(
            dimension_semantics=("parallel", "arbitrary")
        ),
    )(adj, support, bias)


# ---------------------------------------------------------------------------
# Wrapper: pad / cast, run the 4 tiled kernels, slice back to (N, nclass)
# ---------------------------------------------------------------------------
def gcn_forward(x, adj, w1, b1, w2, b2, *, tm=128, tk=128):
    n, nfeat = x.shape
    nhid = w1.shape[1]
    nclass = w2.shape[1]

    n_p = _round_up(n, max(tm, tk))
    nfeat_p = _round_up(nfeat, 128)
    nhid_p = _round_up(nhid, 128)
    nclass_p = _round_up(nclass, 128)

    bf = jnp.bfloat16
    x_p = jnp.zeros((n_p, nfeat_p), bf).at[:n, :nfeat].set(x.astype(bf))
    adj_p = jnp.zeros((n_p, n_p), bf).at[:n, :n].set(adj.astype(bf))
    w1_p = jnp.zeros((nfeat_p, nhid_p), bf).at[:nfeat, :nhid].set(w1.astype(bf))
    w2_p = jnp.zeros((nhid_p, nclass_p), bf).at[:nhid, :nclass].set(w2.astype(bf))
    b1_p = jnp.zeros((1, nhid_p), jnp.float32).at[:, :nhid].set(b1.astype(jnp.float32))
    # Padded class columns get a huge negative bias -> contribute 0 to logsumexp.
    b2_p = jnp.full((1, nclass_p), NEG_INF, jnp.float32).at[:, :nclass].set(
        b2.astype(jnp.float32)
    )

    # ---- Layer 1: h = relu(adj @ (x @ W1) + b1) ----
    s1 = _compute_support(x_p, w1_p, tm=tm)
    h = _aggregate(adj_p, s1, b1_p, tm=tm, tk=tk,
                   epilogue="relu", out_dtype=jnp.bfloat16)

    # Dropout: eval-mode identity.
    # TODO(synk): training-mode dropout via pltpu.prng_seed + pltpu.stateful_bernoulli.

    # ---- Layer 2: z = adj @ (h @ W2) + b2 ; log_softmax ----
    s2 = _compute_support(h, w2_p, tm=tm)
    out_p = _aggregate(adj_p, s2, b2_p, tm=tm, tk=tk,
                       epilogue="log_softmax", out_dtype=jnp.float32)

    return out_p[:n, :nclass]


def _uniform_init(key, shape, fan_out):
    # Mirrors GraphConvolution.reset_parameters: uniform(-1/sqrt(out), 1/sqrt(out))
    stdv = 1.0 / (fan_out ** 0.5)
    return jax.random.uniform(key, shape, jnp.float32, -stdv, stdv)


def _ref_forward(x, adj, w1, b1, w2, b2):
    # Pure-JAX reference with the same bf16 MXU-operand casts as the kernel.
    bf = jnp.bfloat16
    s1 = jnp.dot(x.astype(bf), w1.astype(bf),
                 preferred_element_type=jnp.float32).astype(bf)
    h = jnp.maximum(jnp.dot(adj.astype(bf), s1,
                            preferred_element_type=jnp.float32) + b1, 0.0).astype(bf)
    s2 = jnp.dot(h, w2.astype(bf),
                 preferred_element_type=jnp.float32).astype(bf)
    z = jnp.dot(adj.astype(bf), s2,
                preferred_element_type=jnp.float32) + b2
    return jax.nn.log_softmax(z, axis=1)


if __name__ == "__main__":
    key = jax.random.PRNGKey(0)
    k_x, k_adj, k_w1, k_b1, k_w2, k_b2 = jax.random.split(key, 6)

    # Small synthetic problem: N nodes, nfeat -> nhid -> nclass
    N, nfeat, nhid, nclass = 16, 32, 32, 8

    x = jax.random.normal(k_x, (N, nfeat), jnp.float32)
    # Symmetric, self-looped, row-normalized adjacency (typical GCN preprocessing).
    a = jax.random.uniform(k_adj, (N, N), jnp.float32)
    a = (a + a.T) * 0.5 + jnp.eye(N, dtype=jnp.float32)
    adj = a / jnp.sum(a, axis=1, keepdims=True)

    w1 = _uniform_init(k_w1, (nfeat, nhid), nhid)
    b1 = _uniform_init(k_b1, (1, nhid), nhid)
    w2 = _uniform_init(k_w2, (nhid, nclass), nclass)
    b2 = _uniform_init(k_b2, (1, nclass), nclass)

    out = gcn_forward(x, adj, w1, b1, w2, b2)
    out = jax.block_until_ready(out)

    ref = _ref_forward(x, adj, w1, b1, w2, b2)
    assert out.shape == (N, nclass), f"bad shape {out.shape}"
    assert jnp.all(jnp.isfinite(out)), "non-finite output"
    assert jnp.allclose(out, ref, atol=1e-2, rtol=1e-2), "mismatch vs reference"

    print("KERNEL_OK")
</pallas_src>

<mosaic_0001>
module attributes {stable_mosaic.version = 11 : i64} {
  func.func @_support_kernel(%arg0: i32, %arg1: memref<128x128xbf16, #tpu.memory_space<vmem>>, %arg2: memref<128x128xbf16, #tpu.memory_space<vmem>>, %arg3: memref<128x128xbf16, #tpu.memory_space<vmem>>) attributes {dimension_semantics = [#tpu.dimension_semantics<parallel>], iteration_bounds = array<i64: 1>, scalar_prefetch = 0 : i64, scratch_operands = 0 : i64, tpu.core_type = #tpu.core_type<tc>, window_params = [{transform_indices = @transform_0, window_bounds = array<i64: 128, 128>}, {pipeline_mode = #tpu.pipeline_mode<synchronous>, transform_indices = @transform_1, window_bounds = array<i64: 128, 128>}, {transform_indices = @transform_2, window_bounds = array<i64: 128, 128>}]} {
    %c0 = arith.constant 0 : index
    %c0_0 = arith.constant 0 : index
    %0 = vector.load %arg1[%c0, %c0_0] : memref<128x128xbf16, #tpu.memory_space<vmem>>, vector<128x128xbf16>
    %c0_1 = arith.constant 0 : index
    %c0_2 = arith.constant 0 : index
    %1 = vector.load %arg2[%c0_1, %c0_2] : memref<128x128xbf16, #tpu.memory_space<vmem>>, vector<128x128xbf16>
    %cst = arith.constant dense<0.000000e+00> : vector<128x128xf32>
    %2 = tpu.matmul %0, %1, %cst {dimension_numbers = #tpu.dot_dimension_numbers<[1], [0], [0], [1], [0, 0, 1, 1], [], []>} : vector<128x128xbf16>, vector<128x128xbf16>, vector<128x128xf32> -> vector<128x128xf32>
    %3 = arith.truncf %2 : vector<128x128xf32> to vector<128x128xbf16>
    %c0_3 = arith.constant 0 : index
    %c0_4 = arith.constant 0 : index
    %4 = vector.load %arg3[%c0_3, %c0_4] : memref<128x128xbf16, #tpu.memory_space<vmem>>, vector<128x128xbf16>
    tpu.vector_store %arg3[%c0_3, %c0_4], %3 {strides = array<i32>} : memref<128x128xbf16, #tpu.memory_space<vmem>>, vector<128x128xbf16>,
    return
  }
  func.func @transform_0(%arg0: i32) -> (i32, i32) {
    %c0_i32 = arith.constant 0 : i32
    %c0_i32_0 = arith.constant 0 : i32
    return %arg0, %c0_i32 : i32, i32
  }
  func.func @transform_1(%arg0: i32) -> (i32, i32) {
    %c0_i32 = arith.constant 0 : i32
    %c0_i32_0 = arith.constant 0 : i32
    %c0_i32_1 = arith.constant 0 : i32
    return %c0_i32, %c0_i32_0 : i32, i32
  }
  func.func @transform_2(%arg0: i32) -> (i32, i32) {
    %c0_i32 = arith.constant 0 : i32
    %c0_i32_0 = arith.constant 0 : i32
    return %arg0, %c0_i32 : i32, i32
  }
}

</mosaic_0001>

<bundles_post_ra>
// kernel: tpu_custom_call.1
= control target key start
LH: loop header
LB: loop body
LE: loop exit
PB: predicated region body
PF: predicated region fallthrough
CT: control target
= control target key end

     0   :  { %7 = vsyncpa [#allocation3], 0  ;;  %s545_s0 = inlined_call_operand.hbm [shape: bf16[128,128], index: 0, kind: input, shape index: {}]   ;;  %s546_s1 = inlined_call_operand.hbm [shape: bf16[128,128], index: 1, kind: input, shape index: {}]   ;;  %s547_s2 = inlined_call_operand.hbm [shape: bf16[128,128], index: 2, kind: output, shape index: {}]  }
   0x1   :  { %8 = vsyncpa [#allocation6], 0 }
   0x2   :  { %9 = vsyncpa [#allocation4], 0  ;;  %s14_s11 = sshll.u32 %s545_s0, 4  ;;  %s507_s12 = smov [#allocation2]   ;;  %s15_s11 = int_to_ptr.hbm [resolvable:$true] %s14_s11 }
   0x3   :  { %s16_s13 = sshll.u32 %s507_s12, 4  ;;  %s27_s16 = sshll.u32 %s546_s1, 4  ;;  %s17_s13 = int_to_ptr.vmem [resolvable:$true] %s16_s13  ;;  %s28_s16 = int_to_ptr.hbm [resolvable:$true] %s27_s16 }
   0x4   :  { %s508_s17 = smov 64   ;;  %s509_s18 = smov 4  }
   0x5   :  { %22 = dma.hbm_to_vmem [thread:$0]  %s15_s11, 1024, %s17_s13, [#allocation3], %s508_s17, %s508_s17, %s509_s18  }
   0x6   :  { %s510_s19 = smov [#allocation5]  }
   0x7   :  { %s29_s20 = sshll.u32 %s510_s19, 4  ;;  %s30_s20 = int_to_ptr.vmem [resolvable:$true] %s29_s20 }
   0x8   :  { %35 = dma.hbm_to_vmem [thread:$0]  %s28_s16, 1024, %s30_s20, [#allocation6], %s508_s17, %s508_s17, %s509_s18  }
   0x9   :  { %501 = dma.done.wait [#allocation3], 1024  }
   0xa   :  { %502 = vsyncadd [#allocation3], 4294966272 }
   0xb   :  { %503 = dma.done.wait [#allocation6], 1024  }
   0xc   :  { %504 = vsyncadd [#allocation6], 4294966272  ;;  %v352_v0 = vld [vmem:[#allocation5 + $0x38] sm:$0xff]  ;;  %v351_v1 = vld [vmem:[#allocation5 + $0x30] sm:$0xff]  ;;  %s511_s0 = smov [#allocation7]   ;;  %s259_s23 = sshll.u32 %s547_s2, 4  ;;  %s260_s23 = int_to_ptr.hbm [resolvable:$true] %s259_s23 }
   0xd   :  { %172 = vmatpush.bf16.msra.mxu0 %v352_v0  ;;  %400 = vmatpush.bf16.msra.mxu1 %v352_v0  ;;  %v350_v2 = vld [vmem:[#allocation5 + $0x28] sm:$0xff]  ;;  %v349_v3 = vld [vmem:[#allocation5 + $0x20] sm:$0xff]  ;;  %v348_v4 = vld [vmem:[#allocation5 + $0x18] sm:$0xff]  ;;  %s257_s1 = sshll.u32 %s511_s0, 4  ;;  %s258_s1 = int_to_ptr.vmem [resolvable:$true] %s257_s1 }
   0xe   :  { %401 = vmatpush.bf16.msra.mxu2 %v352_v0  ;;  %402 = vmatpush.bf16.msra.mxu3 %v352_v0  ;;  %v347_v5 = vld [vmem:[#allocation5 + $0x10] sm:$0xff]  ;;  %v346_v6 = vld [vmem:[#allocation5 + $0x8] sm:$0xff]  ;;  %v345_v7 = vld [vmem:[#allocation5] sm:$0xff] }
   0xf   :  { %v337_v8 = vld [vmem:[#allocation2] sm:$0xff]  ;;  %v339_v9 = vld [vmem:[#allocation2 + $0x10] sm:$0xff]  ;;  %v338_v12 = vld [vmem:[#allocation2 + $0x8] sm:$0xff] }
  0x10   :  { %v341_v10 = vld [vmem:[#allocation2 + $0x20] sm:$0xff]  ;;  %v343_v11 = vld [vmem:[#allocation2 + $0x30] sm:$0xff]  ;;  %v340_v13 = vld [vmem:[#allocation2 + $0x18] sm:$0xff] }
  0x11   :  { %173 = vmatpush.bf16.msra.mxu0 %v351_v1  ;;  %403 = vmatpush.bf16.msra.mxu1 %v351_v1  ;;  %v342_v14 = vld [vmem:[#allocation2 + $0x28] sm:$0xff]  ;;  %v344_v15 = vld [vmem:[#allocation2 + $0x38] sm:$0xff] }
  0x12   :  { %404 = vmatpush.bf16.msra.mxu2 %v351_v1  ;;  %405 = vmatpush.bf16.msra.mxu3 %v351_v1 }
  0x15   :  { %174 = vmatpush.bf16.msra.mxu0 %v350_v2  ;;  %406 = vmatpush.bf16.msra.mxu1 %v350_v2 }
  0x16   :  { %407 = vmatpush.bf16.msra.mxu2 %v350_v2  ;;  %408 = vmatpush.bf16.msra.mxu3 %v350_v2 }
  0x19   :  { %175 = vmatpush.bf16.msra.mxu0 %v349_v3  ;;  %409 = vmatpush.bf16.msra.mxu1 %v349_v3 }
  0x1a   :  { %410 = vmatpush.bf16.msra.mxu2 %v349_v3  ;;  %411 = vmatpush.bf16.msra.mxu3 %v349_v3 }
  0x1d   :  { %176 = vmatpush.bf16.msra.mxu0 %v348_v4  ;;  %412 = vmatpush.bf16.msra.mxu1 %v348_v4 }
  0x1e   :  { %413 = vmatpush.bf16.msra.mxu2 %v348_v4  ;;  %414 = vmatpush.bf16.msra.mxu3 %v348_v4 }
  0x21   :  { %177 = vmatpush.bf16.msra.mxu0 %v347_v5  ;;  %415 = vmatpush.bf16.msra.mxu1 %v347_v5 }
  0x22   :  { %416 = vmatpush.bf16.msra.mxu2 %v347_v5  ;;  %417 = vmatpush.bf16.msra.mxu3 %v347_v5 }
  0x25   :  { %178 = vmatpush.bf16.msra.mxu0 %v346_v6  ;;  %418 = vmatpush.bf16.msra.mxu1 %v346_v6 }
  0x26   :  { %419 = vmatpush.bf16.msra.mxu2 %v346_v6  ;;  %420 = vmatpush.bf16.msra.mxu3 %v346_v6 }
  0x29   :  { %179 = vmatpush.bf16.msra.mxu0 %v345_v7  ;;  %421 = vmatpush.bf16.msra.mxu1 %v345_v7 }
  0x2a   :  { %422 = vmatpush.bf16.msra.mxu2 %v345_v7  ;;  %423 = vmatpush.bf16.msra.mxu3 %v345_v7 }
  0x2c   :  { %180 = vmatmul.bf16.vlgmr.msra.gmra.mxu0 %v337_v8  ;;  %190 = vmatmul.bf16.vlgmr.msra.gmra.mxu1 %v339_v9 }
  0x2d   :  { %200 = vmatmul.bf16.vlgmr.msra.gmra.mxu2 %v341_v10  ;;  %210 = vmatmul.bf16.vlgmr.msra.gmra.mxu3 %v343_v11 }
  0x3c   :  { %185 = vmatmul.bf16.gmra.mxu0 %v338_v12  ;;  %195 = vmatmul.bf16.gmra.mxu1 %v340_v13 }
  0x3d   :  { %205 = vmatmul.bf16.gmra.mxu2 %v342_v14  ;;  %215 = vmatmul.bf16.gmra.mxu3 %v344_v15 }
  0xa9   :  { %v181_v16 = vpop.f32.mrf.mxu0  ;;  %v191_v17 = vpop.f32.mrf.mxu1 }
  0xb0   :  { %v201_v18 = vpop.f32.mrf.mxu2  ;;  %v211_v19 = vpop.f32.mrf.mxu3 }
  0xb1   :  { %v183_v20 = vpop.f32.mrf.mxu0  ;;  %v193_v21 = vpop.f32.mrf.mxu1 }
  0xb2   :  { %v356_v22 = vpack.c.bf16 %v183_v20, %v181_v16  ;;  %v366_v23 = vpack.c.bf16 %v193_v21, %v191_v17 }
  0xb4   :  { %357 = vst [vmem:[#allocation7] sm:$0xff] %v356_v22  }
  0xb5   :  { %394 = vst [vmem:[#allocation7 + $0x10] sm:$0xff] %v366_v23  }
  0xb8   :  { %v203_v24 = vpop.f32.mrf.mxu2  ;;  %v213_v25 = vpop.f32.mrf.mxu3 }
  0xb9   :  { %v376_v26 = vpack.c.bf16 %v203_v24, %v201_v18  ;;  %v386_v27 = vpack.c.bf16 %v213_v25, %v211_v19  ;;  %v186_v28 = vpop.f32.mrf.mxu0  ;;  %v196_v29 = vpop.f32.mrf.mxu1 }
  0xbb   :  { %396 = vst [vmem:[#allocation7 + $0x20] sm:$0xff] %v376_v26  }
  0xbc   :  { %398 = vst [vmem:[#allocation7 + $0x30] sm:$0xff] %v386_v27  }
  0xc0   :  { %v206_v30 = vpop.f32.mrf.mxu2  ;;  %v216_v31 = vpop.f32.mrf.mxu3 }
  0xc1   :  { %v188_v32 = vpop.f32.mrf.mxu0  ;;  %v198_v33 = vpop.f32.mrf.mxu1 }
  0xc2   :  { %v361_v34 = vpack.c.bf16 %v188_v32, %v186_v28  ;;  %v371_v35 = vpack.c.bf16 %v198_v33, %v196_v29 }
  0xc4   :  { %393 = vst [vmem:[#allocation7 + $0x8] sm:$0xff] %v361_v34  }
  0xc5   :  { %395 = vst [vmem:[#allocation7 + $0x18] sm:$0xff] %v371_v35  }
  0xc8   :  { %v208_v36 = vpop.f32.mrf.mxu2  ;;  %v218_v37 = vpop.f32.mrf.mxu3 }
  0xc9   :  { %v381_v38 = vpack.c.bf16 %v208_v36, %v206_v30  ;;  %v391_v39 = vpack.c.bf16 %v218_v37, %v216_v31 }
  0xcb   :  { %397 = vst [vmem:[#allocation7 + $0x28] sm:$0xff] %v381_v38  }
  0xcc   :  { %399 = vst [vmem:[#allocation7 + $0x38] sm:$0xff] %v391_v39  }
  0xcd   :  { %265 = dma.vmem_to_hbm [thread:$0]  %s258_s1, 1024, %s260_s23, [#allocation4], %s508_s17, %s508_s17, %s509_s18  }
  0xce   :  { %505 = dma.done.wait [#allocation4], 1024  }
  0xcf   :  { %506 = vsyncadd [#allocation4], 4294966272 }
  0xd0   :  { %270 = vsyncpa [#allocation3], 1 }
  0xd1   :  { %271 = vsyncpa [#allocation6], 1 }
  0xd2   :  { %272 = vsyncpa [#allocation4], 1 }

</bundles_post_ra>
